<compile_context>
chip_gen: v6e
topology: v6e:2x2x1
jax: 0.10.0
libtpu: 0.0.40
codegen_flags: <defaults>
</compile_context>

<pallas_src>
import functools

import jax
import jax.numpy as jnp
from jax.experimental import pallas as pl
from jax.experimental.pallas import tpu as pltpu


def _round_up(x, m):
    return ((x + m - 1) // m) * m


def _value_net_kernel(x_ref, w1_ref, b1_ref, w2_ref, b2_ref, w3_ref, b3_ref,
                      out_ref, *, l3_on_mxu):
    """One batch tile. x_ref is (TILE_B, num_inputs) in native layout."""
    x = x_ref[...]                                            # (TILE_B, in) f32

    # linear1 + relu: contract over the feature axis so the MXU does the
    # "transpose" and the result lands batch-on-lanes: (H, TILE_B).
    h1 = jax.lax.dot_general(
        w1_ref[...], x, dimension_numbers=(((1,), (1,)), ((), ())),
        preferred_element_type=jnp.float32)
    h1 = jnp.maximum(h1 + b1_ref[...], 0.0)                   # (H, TILE_B)

    # linear2 + relu
    h2 = jnp.dot(w2_ref[...], h1, preferred_element_type=jnp.float32)
    h2 = jnp.maximum(h2 + b2_ref[...], 0.0)                   # (H, TILE_B)

    # linear3: single-wide output.
    if l3_on_mxu:
        # Large H: one extra MXU pass (MXU is idle anyway). w3_ref is (8, H)
        # with row 0 the real weights; take row 0 of the (8, TILE_B) result.
        o = jnp.dot(w3_ref[...], h2,
                    preferred_element_type=jnp.float32)[0:1, :]
    else:
        # Small H: VPU broadcast-multiply + sublane reduce; result is already
        # lane-major so the store is a dense (1, TILE_B) vst.
        o = jnp.sum(h2 * w3_ref[...], axis=0, keepdims=True)  # (1, TILE_B)
    out_ref[...] = o + b3_ref[0]


def value_network_forward(state, params, *, tile_b=None):
    """state: [B, num_inputs] float32; params from init_value_network_params."""
    B, num_inputs = state.shape
    w1, b1 = params["w1"], params["b1"]   # (H, in), (H, 1)
    w2, b2 = params["w2"], params["b2"]   # (H, H),  (H, 1)
    w3, b3 = params["w3"], params["b3"]   # (H, 1),  (1,)
    hidden_dim = w1.shape[0]

    # Adaptive, lane-dense batch tile.  Cap at 1024 (safe on v5e's single
    # vector-store slot); B > 1024 automatically yields >= 2 grid blocks so
    # the "parallel" axis feeds both TensorCores on v7x.
    if tile_b is None:
        b128 = _round_up(B, 128)
        cap = 1024                      # sweep 1024-4096 on v6e/v7x for huge B
        n_blocks = pl.cdiv(b128, cap)
        tile_b = _round_up(pl.cdiv(b128, n_blocks), 128)
    else:
        tile_b = _round_up(tile_b, 128)
    n_blocks = pl.cdiv(B, tile_b)
    b_pad = n_blocks * tile_b

    # Only wrapper op: pad the batch dim when it is not a tile multiple.
    x = state.astype(jnp.float32)
    if b_pad != B:
        x = jnp.pad(x, ((0, b_pad - B), (0, 0)))

    # linear3 strategy (static, trace-time): MXU pass for large H, else VPU.
    l3_on_mxu = hidden_dim >= 128
    w3_arg = jnp.pad(w3.T, ((0, 7), (0, 0))) if l3_on_mxu else w3  # (8,H)/(H,1)

    # Weights/biases: full-array blocks with constant index maps -> fetched
    # once and kept VMEM-resident across all batch steps.
    def const_spec(a):
        return pl.BlockSpec(a.shape, lambda i: (0,) * a.ndim)

    flops = 2 * B * (num_inputs * hidden_dim
                     + hidden_dim * hidden_dim
                     + hidden_dim)
    bytes_accessed = 4 * (B * num_inputs + w1.size + b1.size + w2.size
                          + b2.size + w3.size + b3.size + B)

    out = pl.pallas_call(
        functools.partial(_value_net_kernel, l3_on_mxu=l3_on_mxu),
        out_shape=jax.ShapeDtypeStruct((1, b_pad), jnp.float32),
        grid=(n_blocks,),
        in_specs=[
            pl.BlockSpec((tile_b, num_inputs), lambda i: (i, 0)),  # state tile
            const_spec(w1), const_spec(b1),
            const_spec(w2), const_spec(b2),
            const_spec(w3_arg),
            pl.BlockSpec(memory_space=pltpu.MemorySpace.SMEM),     # b3 scalar
        ],
        out_specs=pl.BlockSpec((1, tile_b), lambda i: (0, i)),     # lane-dense
        compiler_params=pltpu.CompilerParams(
            dimension_semantics=("parallel",)),
        cost_estimate=pl.CostEstimate(
            flops=flops, transcendentals=0, bytes_accessed=bytes_accessed),
    )(x, w1, b1, w2, b2, w3_arg, b3)

    return out[0, :B].reshape(B, 1)


def init_value_network_params(key, num_inputs, hidden_dim):
    """Xavier-uniform weights (gain=1), zero biases — matches weights_init_.

    Weights stay in PyTorch [out, in] layout (the kernel contracts over the
    feature axis, batch on lanes); biases are columns so they broadcast over
    lanes inside the kernel.
    """
    def xavier(key, fan_out, fan_in):
        limit = jnp.sqrt(6.0 / (fan_in + fan_out))
        return jax.random.uniform(key, (fan_out, fan_in), jnp.float32,
                                  minval=-limit, maxval=limit)

    k1, k2, k3 = jax.random.split(key, 3)
    return {
        "w1": xavier(k1, hidden_dim, num_inputs),        # (H, in)
        "b1": jnp.zeros((hidden_dim, 1), jnp.float32),
        "w2": xavier(k2, hidden_dim, hidden_dim),        # (H, H)
        "b2": jnp.zeros((hidden_dim, 1), jnp.float32),
        "w3": xavier(k3, 1, hidden_dim).T,               # stored as (H, 1)
        "b3": jnp.zeros((1,), jnp.float32),
    }


def _reference_forward(state, params):
    hi = jax.lax.Precision.HIGHEST
    h1 = jnp.maximum(
        jnp.matmul(state, params["w1"].T, precision=hi) + params["b1"].T, 0.0)
    h2 = jnp.maximum(
        jnp.matmul(h1, params["w2"].T, precision=hi) + params["b2"].T, 0.0)
    return jnp.sum(h2 * params["w3"].T, axis=-1, keepdims=True) + params["b3"]


if __name__ == "__main__":
    key = jax.random.PRNGKey(0)
    k_params, k_state, k_big, kp256, ks256 = jax.random.split(key, 5)

    # Small shape consistent with the module (VPU linear3 path).
    num_inputs, hidden_dim = 16, 32
    params = init_value_network_params(k_params, num_inputs, hidden_dim)
    batch = 8
    state = jax.random.normal(k_state, (batch, num_inputs), jnp.float32)
    out = jax.block_until_ready(value_network_forward(state, params))
    ref = _reference_forward(state, params)
    assert out.shape == (batch, 1)
    assert jnp.allclose(out, ref, atol=1e-3, rtol=1e-3)

    # Larger batch: adaptive tiling picks 2 grid blocks (768 each) -> weights
    # VMEM-resident, state/output tiles double-buffered, both TCs fed on v7x.
    big_batch = 1536
    state_big = jax.random.normal(k_big, (big_batch, num_inputs), jnp.float32)
    out_big = jax.block_until_ready(value_network_forward(state_big, params))
    ref_big = _reference_forward(state_big, params)
    assert out_big.shape == (big_batch, 1)
    assert jnp.allclose(out_big, ref_big, atol=1e-3, rtol=1e-3)

    # SAC-typical hidden_dim=256 exercises the MXU linear3 epilogue path.
    params256 = init_value_network_params(kp256, num_inputs, 256)
    state256 = jax.random.normal(ks256, (256, num_inputs), jnp.float32)
    out256 = jax.block_until_ready(value_network_forward(state256, params256))
    ref256 = _reference_forward(state256, params256)
    assert out256.shape == (256, 1)
    assert jnp.allclose(out256, ref256, atol=1e-3, rtol=1e-3)

    print("KERNEL_OK")
</pallas_src>

<mosaic_0001>
module attributes {stable_mosaic.version = 11 : i64} {
  func.func @_value_net_kernel(%arg0: i32, %arg1: memref<128x16xf32, #tpu.memory_space<vmem>>, %arg2: memref<32x16xf32, #tpu.memory_space<vmem>>, %arg3: memref<32x1xf32, #tpu.memory_space<vmem>>, %arg4: memref<32x32xf32, #tpu.memory_space<vmem>>, %arg5: memref<32x1xf32, #tpu.memory_space<vmem>>, %arg6: memref<32x1xf32, #tpu.memory_space<vmem>>, %arg7: memref<1xf32, #tpu.memory_space<smem>>, %arg8: memref<1x128xf32, #tpu.memory_space<vmem>>) attributes {dimension_semantics = [#tpu.dimension_semantics<parallel>], iteration_bounds = array<i64: 1>, scalar_prefetch = 0 : i64, scratch_operands = 0 : i64, tpu.core_type = #tpu.core_type<tc>, window_params = [{transform_indices = @transform_0, window_bounds = array<i64: 128, 16>}, {pipeline_mode = #tpu.pipeline_mode<synchronous>, transform_indices = @transform_1, window_bounds = array<i64: 32, 16>}, {pipeline_mode = #tpu.pipeline_mode<synchronous>, transform_indices = @transform_2, window_bounds = array<i64: 32, 1>}, {pipeline_mode = #tpu.pipeline_mode<synchronous>, transform_indices = @transform_3, window_bounds = array<i64: 32, 32>}, {pipeline_mode = #tpu.pipeline_mode<synchronous>, transform_indices = @transform_4, window_bounds = array<i64: 32, 1>}, {pipeline_mode = #tpu.pipeline_mode<synchronous>, transform_indices = @transform_5, window_bounds = array<i64: 32, 1>}, {transform_indices = @transform_6, window_bounds = array<i64: 1>}, {transform_indices = @transform_7, window_bounds = array<i64: 1, 128>}]} {
    %c0 = arith.constant 0 : index
    %c0_0 = arith.constant 0 : index
    %0 = vector.load %arg1[%c0, %c0_0] : memref<128x16xf32, #tpu.memory_space<vmem>>, vector<128x16xf32>
    %c0_1 = arith.constant 0 : index
    %c0_2 = arith.constant 0 : index
    %1 = vector.load %arg2[%c0_1, %c0_2] : memref<32x16xf32, #tpu.memory_space<vmem>>, vector<32x16xf32>
    %cst = arith.constant dense<0.000000e+00> : vector<32x128xf32>
    %2 = tpu.matmul %1, %0, %cst {dimension_numbers = #tpu.dot_dimension_numbers<[1], [1], [0], [0], [0, 0, 1, 0], [], []>} : vector<32x16xf32>, vector<128x16xf32>, vector<32x128xf32> -> vector<32x128xf32>
    %c0_3 = arith.constant 0 : index
    %c0_4 = arith.constant 0 : index
    %3 = vector.load %arg3[%c0_3, %c0_4] : memref<32x1xf32, #tpu.memory_space<vmem>>, vector<32x1xf32>
    %4 = vector.broadcast %3 : vector<32x1xf32> to vector<32x128xf32>
    %5 = arith.addf %2, %4 : vector<32x128xf32>
    %cst_5 = arith.constant 0.000000e+00 : f32
    %6 = vector.broadcast %cst_5 : f32 to vector<32x128xf32>
    %7 = arith.maximumf %5, %6 : vector<32x128xf32>
    %c0_6 = arith.constant 0 : index
    %c0_7 = arith.constant 0 : index
    %8 = vector.load %arg4[%c0_6, %c0_7] : memref<32x32xf32, #tpu.memory_space<vmem>>, vector<32x32xf32>
    %cst_8 = arith.constant dense<0.000000e+00> : vector<32x128xf32>
    %9 = tpu.matmul %8, %7, %cst_8 {dimension_numbers = #tpu.dot_dimension_numbers<[1], [0], [0], [1], [0, 0, 1, 1], [], []>} : vector<32x32xf32>, vector<32x128xf32>, vector<32x128xf32> -> vector<32x128xf32>
    %c0_9 = arith.constant 0 : index
    %c0_10 = arith.constant 0 : index
    %10 = vector.load %arg5[%c0_9, %c0_10] : memref<32x1xf32, #tpu.memory_space<vmem>>, vector<32x1xf32>
    %11 = vector.broadcast %10 : vector<32x1xf32> to vector<32x128xf32>
    %12 = arith.addf %9, %11 : vector<32x128xf32>
    %cst_11 = arith.constant 0.000000e+00 : f32
    %13 = vector.broadcast %cst_11 : f32 to vector<32x128xf32>
    %14 = arith.maximumf %12, %13 : vector<32x128xf32>
    %c0_12 = arith.constant 0 : index
    %c0_13 = arith.constant 0 : index
    %15 = vector.load %arg6[%c0_12, %c0_13] : memref<32x1xf32, #tpu.memory_space<vmem>>, vector<32x1xf32>
    %16 = vector.broadcast %15 : vector<32x1xf32> to vector<32x128xf32>
    %17 = arith.mulf %14, %16 : vector<32x128xf32>
    %cst_14 = arith.constant dense<0.000000e+00> : vector<128xf32>
    %18 = vector.multi_reduction <add>, %17, %cst_14 [0] : vector<32x128xf32> to vector<128xf32>
    %19 = vector.shape_cast %18 : vector<128xf32> to vector<1x128xf32>
    %c0_15 = arith.constant 0 : index
    %20 = memref.load %arg7[%c0_15] : memref<1xf32, #tpu.memory_space<smem>>
    %21 = vector.broadcast %20 : f32 to vector<1x128xf32>
    %22 = arith.addf %19, %21 : vector<1x128xf32>
    %c0_16 = arith.constant 0 : index
    %c0_17 = arith.constant 0 : index
    %23 = vector.load %arg8[%c0_16, %c0_17] : memref<1x128xf32, #tpu.memory_space<vmem>>, vector<1x128xf32>
    tpu.vector_store %arg8[%c0_16, %c0_17], %22 {strides = array<i32>} : memref<1x128xf32, #tpu.memory_space<vmem>>, vector<1x128xf32>,
    return
  }
  func.func @transform_0(%arg0: i32) -> (i32, i32) {
    %c0_i32 = arith.constant 0 : i32
    %c0_i32_0 = arith.constant 0 : i32
    return %arg0, %c0_i32 : i32, i32
  }
  func.func @transform_1(%arg0: i32) -> (i32, i32) {
    %c0_i32 = arith.constant 0 : i32
    %c0_i32_0 = arith.constant 0 : i32
    %c0_i32_1 = arith.constant 0 : i32
    return %c0_i32, %c0_i32_0 : i32, i32
  }
  func.func @transform_2(%arg0: i32) -> (i32, i32) {
    %c0_i32 = arith.constant 0 : i32
    %c0_i32_0 = arith.constant 0 : i32
    %c0_i32_1 = arith.constant 0 : i32
    return %c0_i32, %c0_i32_0 : i32, i32
  }
  func.func @transform_3(%arg0: i32) -> (i32, i32) {
    %c0_i32 = arith.constant 0 : i32
    %c0_i32_0 = arith.constant 0 : i32
    %c0_i32_1 = arith.constant 0 : i32
    return %c0_i32, %c0_i32_0 : i32, i32
  }
  func.func @transform_4(%arg0: i32) -> (i32, i32) {
    %c0_i32 = arith.constant 0 : i32
    %c0_i32_0 = arith.constant 0 : i32
    %c0_i32_1 = arith.constant 0 : i32
    return %c0_i32, %c0_i32_0 : i32, i32
  }
  func.func @transform_5(%arg0: i32) -> (i32, i32) {
    %c0_i32 = arith.constant 0 : i32
    %c0_i32_0 = arith.constant 0 : i32
    %c0_i32_1 = arith.constant 0 : i32
    return %c0_i32, %c0_i32_0 : i32, i32
  }
  func.func @transform_6(%arg0: i32) -> i32 {
    %c0_i32 = arith.constant 0 : i32
    %c0_i32_0 = arith.constant 0 : i32
    return %c0_i32 : i32
  }
  func.func @transform_7(%arg0: i32) -> (i32, i32) {
    %c0_i32 = arith.constant 0 : i32
    %c0_i32_0 = arith.constant 0 : i32
    return %c0_i32, %arg0 : i32, i32
  }
}

</mosaic_0001>

<bundles_post_ra>
// kernel: tpu_custom_call.1
= control target key start
LH: loop header
LB: loop body
LE: loop exit
PB: predicated region body
PF: predicated region fallthrough
CT: control target
= control target key end

     0   :  { %vm72_vm0 = vcmask 130048   ;;  %v537_v2 = vmov 0   ;;  %s733_s0 = inlined_call_operand.vmem [shape: f32[128,16], index: 0, kind: input, shape index: {}]   ;;  %s734_s1 = inlined_call_operand.vmem [shape: f32[32,16], index: 1, kind: input, shape index: {}]   ;;  %s735_s2 = inlined_call_operand.vmem [shape: f32[32,1], index: 2, kind: input, shape index: {}]   ;;  %s736_s3 = inlined_call_operand.vmem [shape: f32[32,32], index: 3, kind: input, shape index: {}]   ;;  %s737_s4 = inlined_call_operand.vmem [shape: f32[32,1], index: 4, kind: input, shape index: {}]   ;;  %s738_s5 = inlined_call_operand.vmem [shape: f32[32,1], index: 5, kind: input, shape index: {}]   ;;  %s739_s6 = inlined_call_operand.<no memory space> [shape: f32[1], index: 6, kind: input, shape index: {}]   ;;  %s740_s7 = inlined_call_operand.hbm [shape: f32[1,128], index: 7, kind: output, shape index: {}]  }
   0x1   :  { %v43_v0 = vld [vmem:[%s733_s0 + $0x78] sm:$0xff]  ;;  %v42_v1 = vld [vmem:[%s733_s0 + $0x70] sm:$0xff]  ;;  %513 = vset.pattern.permute.xlu0 %v537_v2  ;;  %514 = vset.pattern.permute.xlu1 %v537_v2  ;;  %v41_v3 = vld [vmem:[%s733_s0 + $0x68] sm:$0xff] }
   0x2   :  { %459 = vmatprep.subr.msk.mxu0 %vm72_vm0, %v43_v0  ;;  %v44_v4 = vld [vmem:[%s734_s1] sm:$0xff]  ;;  %v51_v5 = vld [vmem:[%s735_s2 + $0x18] sm:$0xff]  ;;  %v49_v6 = vld [vmem:[%s735_s2 + $0x8] sm:$0xff] }
   0x3   :  { %460 = vmatpush3.xpose.msk.msra.mxu0 %vm72_vm0, %v43_v0  ;;  %491 = vmatprep.mubr.msk.f32.mxu0 %vm72_vm0, %v44_v4  ;;  %v40_v7 = vld [vmem:[%s733_s0 + $0x60] sm:$0xff]  ;;  %v50_v8 = vld [vmem:[%s735_s2 + $0x10] sm:$0xff] }
   0x4   :  { %461 = vmatprep.subr.msk.mxu0 %vm72_vm0, %v42_v1  ;;  %69 = vperm.xlu0 %513, %v51_v5   ;;  %v48_v9 = vld [vmem:[%s735_s2] sm:$0xff] }
   0x5   :  { %59 = vperm.xlu1 %514, %v49_v6  }
   0x7   :  { %462 = vmatpush3.xpose.msk.msra.mxu0 %vm72_vm0, %v42_v1 }
   0x8   :  { %463 = vmatprep.subr.msk.mxu0 %vm72_vm0, %v41_v3 }
   0xb   :  { %464 = vmatpush3.xpose.msk.msra.mxu0 %vm72_vm0, %v41_v3 }
   0xc   :  { %13 = vsyncpa [#allocation4], 0  ;;  %465 = vmatprep.subr.msk.mxu0 %vm72_vm0, %v40_v7  ;;  %64 = vperm.xlu0 %513, %v50_v8   ;;  %v39_v10 = vld [vmem:[%s733_s0 + $0x58] sm:$0xff]  ;;  %v226_v11 = vld [vmem:[%s737_s4] sm:$0xff]  ;;  %vm250_vm1 = vcmask 261120   ;;  %s538_s21 = smov [#allocation3]  }
   0xd   :  { %54 = vperm.xlu1 %514, %v48_v9   ;;  %v227_v12 = vld [vmem:[%s737_s4 + $0x8] sm:$0xff]  ;;  %v38_v13 = vld [vmem:[%s733_s0 + $0x50] sm:$0xff]  ;;  %v229_v15 = vld [vmem:[%s737_s4 + $0x18] sm:$0xff] }
   0xe   :  { %v228_v14 = vld [vmem:[%s737_s4 + $0x10] sm:$0xff]  ;;  %v37_v16 = vld [vmem:[%s733_s0 + $0x48] sm:$0xff]  ;;  %v352_v17 = vld [vmem:[%s738_s5] sm:$0xff] }
   0xf   :  { %466 = vmatpush3.xpose.msk.msra.mxu0 %vm72_vm0, %v40_v7  ;;  %v353_v18 = vld [vmem:[%s738_s5 + $0x8] sm:$0xff]  ;;  %v36_v19 = vld [vmem:[%s733_s0 + $0x40] sm:$0xff]  ;;  %v354_v20 = vld [vmem:[%s738_s5 + $0x10] sm:$0xff] }
  0x10   :  { %467 = vmatprep.subr.msk.mxu0 %vm72_vm0, %v39_v10  ;;  %232 = vperm.xlu0 %513, %v226_v11   ;;  %v355_v21 = vld [vmem:[%s738_s5 + $0x18] sm:$0xff]  ;;  %v34_v23 = vld [vmem:[%s733_s0 + $0x30] sm:$0xff]  ;;  %v33_v24 = vld [vmem:[%s733_s0 + $0x28] sm:$0xff]  ;;  %s399_s5 = sshll.u32 %s538_s21, 4  ;;  %s400_s5 = int_to_ptr.vmem [resolvable:$true] %s399_s5 }
  0x11   :  { %237 = vperm.xlu1 %514, %v227_v12   ;;  %v35_v22 = vld [vmem:[%s733_s0 + $0x38] sm:$0xff]  ;;  %v32_v25 = vld [vmem:[%s733_s0 + $0x20] sm:$0xff]  ;;  %v30_v27 = vld [vmem:[%s733_s0 + $0x10] sm:$0xff]  ;;  %s515_s22 = scalar_lea.vmem %s400_s5, 16  ;;  %s519_s23 = scalar_lea.vmem %s400_s5, 32 }
  0x12   :  { %v31_v26 = vld [vmem:[%s733_s0 + $0x18] sm:$0xff]  ;;  %v29_v28 = vld [vmem:[%s733_s0 + $0x8] sm:$0xff]  ;;  %v28_v29 = vld [vmem:[%s733_s0] sm:$0xff]  ;;  %p516_p0 = scmp.ne.s32.totalorder %s400_s5, %s515_s22  ;;  %p520_p1 = scmp.lt.s32.totalorder %s400_s5, %s400_s5 }
  0x13   :  { %468 = vmatpush3.xpose.msk.msra.mxu0 %vm72_vm0, %v39_v10  ;;  %v45_v30 = vld [vmem:[%s734_s1 + $0x8] sm:$0xff]  ;;  %v46_v31 = vld [vmem:[%s734_s1 + $0x10] sm:$0xff]  ;;  %v47_v32 = vld [vmem:[%s734_s1 + $0x18] sm:$0xff]  ;;  %p521_p2 = scmp.lt.s32.totalorder %s519_s23, %s515_s22 }
  0x14   :  { %469 = vmatprep.subr.msk.mxu0 %vm72_vm0, %v38_v13  ;;  %242 = vperm.xlu0 %513, %v228_v14   ;;  %v222_v33 = vld [vmem:[%s736_s3] sm:$0xff]  ;;  %v223_v50 = vld [vmem:[%s736_s3 + $0x8] sm:$0xff]  ;;  %v224_v51 = vld [vmem:[%s736_s3 + $0x10] sm:$0xff] }
  0x15   :  { %247 = vperm.xlu1 %514, %v229_v15   ;;  %505 = vmatprep.mubr.msk.f32.mxu1 %vm250_vm1, %v222_v33  ;;  %v225_v52 = vld [vmem:[%s736_s3 + $0x18] sm:$0xff]  ;;  %p522_p3 = por %p521_p2, %p520_p1 }
  0x17   :  { %470 = vmatpush3.xpose.msk.msra.mxu0 %vm72_vm0, %v38_v13  ;;  %p523_p4 = pnand %p522_p3, %p516_p0 }
  0x18   :  { %471 = vmatprep.subr.msk.mxu0 %vm72_vm0, %v37_v16  ;;  %358 = vperm.xlu0 %513, %v352_v17  }
  0x19   :  { %363 = vperm.xlu1 %514, %v353_v18  }
  0x1b   :  { %472 = vmatpush3.xpose.msk.msra.mxu0 %vm72_vm0, %v37_v16 }
  0x1c   :  { %473 = vmatprep.subr.msk.mxu0 %vm72_vm0, %v36_v19  ;;  %368 = vperm.xlu0 %513, %v354_v20  }
  0x1d   :  { %373 = vperm.xlu1 %514, %v355_v21   ;;  %v390_v21 = vstv %s739_s6 }
  0x1f   :  { %474 = vmatpush3.xpose.msk.msra.mxu0 %vm72_vm0, %v36_v19 }
  0x20   :  { %475 = vmatprep.subr.msk.mxu0 %vm72_vm0, %v35_v22 }
  0x23   :  { %476 = vmatpush3.xpose.msk.msra.mxu0 %vm72_vm0, %v35_v22 }
  0x24   :  { %477 = vmatprep.subr.msk.mxu0 %vm72_vm0, %v34_v23 }
  0x27   :  { %478 = vmatpush3.xpose.msk.msra.mxu0 %vm72_vm0, %v34_v23 }
  0x28   :  { %479 = vmatprep.subr.msk.mxu0 %vm72_vm0, %v33_v24 }
  0x2b   :  { %480 = vmatpush3.xpose.msk.msra.mxu0 %vm72_vm0, %v33_v24 }
  0x2c   :  { %481 = vmatprep.subr.msk.mxu0 %vm72_vm0, %v32_v25 }
  0x2f   :  { %482 = vmatpush3.xpose.msk.msra.mxu0 %vm72_vm0, %v32_v25 }
  0x30   :  { %483 = vmatprep.subr.msk.mxu0 %vm72_vm0, %v31_v26 }
  0x33   :  { %484 = vmatpush3.xpose.msk.msra.mxu0 %vm72_vm0, %v31_v26 }
  0x34   :  { %485 = vmatprep.subr.msk.mxu0 %vm72_vm0, %v30_v27 }
  0x37   :  { %486 = vmatpush3.xpose.msk.msra.mxu0 %vm72_vm0, %v30_v27 }
  0x38   :  { %487 = vmatprep.subr.msk.mxu0 %vm72_vm0, %v29_v28 }
  0x3b   :  { %488 = vmatpush3.xpose.msk.msra.mxu0 %vm72_vm0, %v29_v28 }
  0x3c   :  { %489 = vmatprep.subr.msk.mxu0 %vm72_vm0, %v28_v29 }
  0x3f   :  { %490 = vmatpush3.xpose.msk.msra.mxu0 %vm72_vm0, %v28_v29 }
  0x42   :  { %492 = vmatmul.mubr.msk.f32.vlgmr.msra.gmra.mxu0 %vm72_vm0, %v45_v30 }
  0x43   :  { %494 = vmatprep.mubr.msk.f32.mxu0 %vm72_vm0, %v46_v31 }
  0x46   :  { %495 = vmatmul.mubr.msk.f32.gmra.mxu0 %vm72_vm0, %v47_v32 }
  0x7f   :  { %v70_v34 = vpop.permute.xlu0 %69 }
  0x80   :  { %v60_v36 = vpop.permute.xlu1 %59 }
  0x87   :  { %v65_v40 = vpop.permute.xlu0 %64 }
  0x88   :  { %v55_v45 = vpop.permute.xlu1 %54 }
  0x8b   :  { %v233_v53 = vpop.permute.xlu0 %232 }
  0x8c   :  { %v238_v54 = vpop.permute.xlu1 %237 }
  0x8f   :  { %v243_v55 = vpop.permute.xlu0 %242 }
  0x90   :  { %v248_v56 = vpop.permute.xlu1 %247 }
  0x93   :  { %v359_v61 = vpop.permute.xlu0 %358 }
  0x94   :  { %v364_v2 = vpop.permute.xlu1 %363 }
  0x97   :  { %v369_v9 = vpop.permute.xlu0 %368 }
  0x98   :  { %v374_v12 = vpop.permute.xlu1 %373 }
 0x102   :  { %v493_v35 = vpop.f32.mrf.mxu0 }
 0x103   :  { %v205_v42 = vadd.f32 %v493_v35, %v60_v36 }
 0x104   :  { %v199_v37 = vpop.f32.mrf.mxu0 }
 0x105   :  { %v200_v46 = vadd.f32 %v199_v37, %v55_v45  ;;  %v219_v48 = vmax.f32 %v205_v42, 0.0 }
 0x106   :  { %v496_v38 = vpop.f32.mrf.mxu0 }
 0x107   :  { %v215_v39 = vadd.f32 %v496_v38, %v70_v34  ;;  %v218_v49 = vmax.f32 %v200_v46, 0.0 }
 0x108   :  { %v209_v41 = vpop.f32.mrf.mxu0 }
 0x109   :  { %v221_v43 = vmax.f32 %v215_v39, 0.0  ;;  %v210_v44 = vadd.f32 %v209_v41, %v65_v40 }
 0x10b   :  { %v220_v47 = vmax.f32 %v210_v44, 0.0  ;;  %497 = vmatprep.subr.mxu1 %v221_v43 }
 0x10c   :  { %498 = vmatpush3.msra.mxu1 %v221_v43 }
 0x10d   :  { %499 = vmatprep.subr.mxu1 %v220_v47 }
 0x10e   :  { %500 = vmatpush3.msra.mxu1 %v220_v47 }
 0x10f   :  { %501 = vmatprep.subr.mxu1 %v219_v48 }
 0x110   :  { %502 = vmatpush3.msra.mxu1 %v219_v48 }
 0x111   :  { %503 = vmatprep.subr.mxu1 %v218_v49 }
 0x112   :  { %504 = vmatpush3.msra.mxu1 %v218_v49 }
 0x113   :  { %506 = vmatmul.mubr.msk.f32.vlgmr.msra.gmra.mxu1 %vm250_vm1, %v223_v50 }
 0x114   :  { %508 = vmatprep.mubr.msk.f32.mxu1 %vm250_vm1, %v224_v51 }
 0x117   :  { %509 = vmatmul.mubr.msk.f32.gmra.mxu1 %vm250_vm1, %v225_v52 }
 0x1d3   :  { %v507_v57 = vpop.f32.mrf.mxu1 }
 0x1d4   :  { %v335_v58 = vadd.f32 %v507_v57, %v238_v54 }
 0x1d5   :  { %v329_v59 = vpop.f32.mrf.mxu1 }
 0x1d6   :  { %v330_v60 = vadd.f32 %v329_v59, %v233_v53  ;;  %v349_v63 = vmax.f32 %v335_v58, 0.0 }
 0x1d7   :  { %v510_v62 = vpop.f32.mrf.mxu1 }
 0x1d8   :  { %v348_v0 = vmax.f32 %v330_v60, 0.0  ;;  %v345_v1 = vadd.f32 %v510_v62, %v248_v56  ;;  %v377_v6 = vmul.f32 %v364_v2, %v349_v63 }
 0x1d9   :  { %v339_v3 = vpop.f32.mrf.mxu1 }
 0x1da   :  { %v376_v4 = vmul.f32 %v359_v61, %v348_v0  ;;  %v340_v5 = vadd.f32 %v339_v3, %v243_v55  ;;  %v351_v7 = vmax.f32 %v345_v1, 0.0 }
 0x1dc   :  { %v350_v8 = vmax.f32 %v340_v5, 0.0  ;;  %v380_v10 = vadd.f32 %v377_v6, %v376_v4  ;;  %v379_v13 = vmul.f32 %v374_v12, %v351_v7 }
 0x1de   :  { %v378_v11 = vmul.f32 %v369_v9, %v350_v8 }
 0x1e0   :  { %v381_v14 = vadd.f32 %v380_v10, %v378_v11 }
 0x1e2   :  { %v382_v15 = vadd.f32 %v381_v14, %v379_v13 }
 0x1e4   :  { %v383_v16 = vrot.slane %v382_v15, 4 }
 0x1e6   :  { %v384_v17 = vadd.f32 %v383_v16, %v382_v15 }
 0x1e8   :  { %v385_v18 = vrot.slane %v384_v17, 2 }
 0x1ea   :  { %v386_v19 = vadd.f32 %v385_v18, %v384_v17 }
 0x1ec   :  { %v387_v20 = vrot.slane %v386_v19, 1 }
 0x1ee   :  { %v388_v22 = vadd.f32 %v387_v20, %v386_v19 }
 0x1f0   :  { %v391_v23 = vadd.f32 %v390_v21, %v388_v22 }
 0x1f2   :  { %392 = vst [vmem:[#allocation3] sm:$0x1] %v391_v23 }
 0x1f3   :  { %526 = shalt.err (!%p523_p4)
}
 0x1f4   :  { %402 = dma.vmem_to_hbm [thread:$0]  %s400_s5, 16, %s740_s7, [#allocation4]  }
 0x1f5   :  { %535 = dma.done.wait [#allocation4], 16  }
 0x1f6   :  { %536 = vsyncadd [#allocation4], 4294967280 }
 0x1f7   :  { %406 = vsyncpa [#allocation4], 1 }

</bundles_post_ra>
